<compile_context>
chip_gen: v6e
topology: v6e:2x2x1
jax: 0.10.0
libtpu: 0.0.40
codegen_flags: <defaults>
</compile_context>

<pallas_src>
import functools

import jax
import jax.numpy as jnp
from jax.experimental import pallas as pl
from jax.experimental.pallas import tpu as pltpu


def actor_kernel(xT_ref, w1T_ref, b1_ref, w2T_ref, b2_ref, out_ref):
    # Hidden layer: (H, S) @ (S, TB) + (H, 1) -> tanh -> (H, TB)
    h = jnp.tanh(
        jnp.dot(w1T_ref[...], xT_ref[...], preferred_element_type=jnp.float32)
        + b1_ref[...]
    )

    # Output layer: (A, H) @ (H, TB) + (A, 1) -> (A, TB)
    logits = (
        jnp.dot(w2T_ref[...], h, preferred_element_type=jnp.float32)
        + b2_ref[...]
    )

    # Numerically stable softmax over the action axis (axis 0, sublanes).
    # Exact divide: probabilities must sum to 1 (they feed Categorical
    # sampling / log-probs in the policy-gradient update).
    m = jnp.max(logits, axis=0, keepdims=True)
    e = jnp.exp(logits - m)
    denom = jnp.sum(e, axis=0, keepdims=True)
    out_ref[...] = e / denom


def _round_up(x, m):
    return ((x + m - 1) // m) * m


@functools.partial(jax.jit, static_argnames=("num_tiles",))
def actor_forward(state, w1, b1, w2, b2, *, num_tiles=1):
    """softmax(tanh(state @ w1 + b1) @ w2 + b2), batched over rows of state.

    num_tiles=1 is best on v5e/v6e (single grid step, zero pipeline overhead).
    num_tiles=2 on v7x gives one batch tile per TensorCore (megacore).
    """
    B, S = state.shape
    H = w1.shape[1]
    A = w2.shape[1]

    # Batch on the lane axis, padded to a whole number of 128-lane tiles.
    B_pad = _round_up(B, 128 * num_tiles)
    tb = B_pad // num_tiles

    # Single fused pad; padded columns are zeros -> finite softmax, sliced off.
    x_t = jnp.pad(state.astype(jnp.float32).T, ((0, 0), (0, B_pad - B)))

    w1_t = w1.astype(jnp.float32).T            # (H, S)
    b1_c = b1.astype(jnp.float32).reshape(H, 1)
    w2_t = w2.astype(jnp.float32).T            # (A, H)
    b2_c = b2.astype(jnp.float32).reshape(A, 1)

    cost = pl.CostEstimate(
        flops=2 * B_pad * (S * H + H * A),
        transcendentals=B_pad * (H + A),       # tanh + exp
        bytes_accessed=4 * (x_t.size + w1_t.size + b1_c.size
                            + w2_t.size + b2_c.size + A * B_pad),
    )

    out_t = pl.pallas_call(
        actor_kernel,
        out_shape=jax.ShapeDtypeStruct((A, B_pad), jnp.float32),
        grid_spec=pl.GridSpec(
            grid=(num_tiles,),
            in_specs=[
                # Activation tile streams with the grid (lane-dense blocks).
                pl.BlockSpec((S, tb), lambda i: (0, i)),
                # Weights / biases: same block every step -> VMEM resident.
                pl.BlockSpec((H, S), lambda i: (0, 0)),
                pl.BlockSpec((H, 1), lambda i: (0, 0)),
                pl.BlockSpec((A, H), lambda i: (0, 0)),
                pl.BlockSpec((A, 1), lambda i: (0, 0)),
            ],
            out_specs=pl.BlockSpec((A, tb), lambda i: (0, i)),
        ),
        compiler_params=pltpu.CompilerParams(
            # Batch tiles are independent -> sharded across TCs on v7x.
            dimension_semantics=("parallel",)),
        cost_estimate=cost,
    )(x_t, w1_t, b1_c, w2_t, b2_c)

    return out_t[:, :B].T                       # (B, A)


def init_actor_params(key, state_size, action_size, hidden=64):
    """Deterministic init mimicking PyTorch's default Linear init
    (uniform in +/- 1/sqrt(fan_in))."""
    k1, k2, k3, k4 = jax.random.split(key, 4)
    bound1 = 1.0 / jnp.sqrt(jnp.float32(state_size))
    bound2 = 1.0 / jnp.sqrt(jnp.float32(hidden))
    w1 = jax.random.uniform(k1, (state_size, hidden), jnp.float32,
                            minval=-bound1, maxval=bound1)
    b1 = jax.random.uniform(k2, (1, hidden), jnp.float32,
                            minval=-bound1, maxval=bound1)
    w2 = jax.random.uniform(k3, (hidden, action_size), jnp.float32,
                            minval=-bound2, maxval=bound2)
    b2 = jax.random.uniform(k4, (1, action_size), jnp.float32,
                            minval=-bound2, maxval=bound2)
    return w1, b1, w2, b2


if __name__ == "__main__":
    # CartPole-like sizes: state_size=4, action_size=2.  Batch of rollout
    # states chosen so the lane padding (200 -> 256) is exercised.
    state_size, action_size, batch = 4, 2, 200

    key = jax.random.PRNGKey(0)
    kx, kp = jax.random.split(key)
    state = jax.random.normal(kx, (batch, state_size), jnp.float32)
    w1, b1, w2, b2 = init_actor_params(kp, state_size, action_size)

    probs = actor_forward(state, w1, b1, w2, b2)   # num_tiles=2 on v7x
    probs = jax.block_until_ready(probs)

    # Pure-JAX reference check.
    h = jnp.tanh(state @ w1 + b1)
    ref = jax.nn.softmax(h @ w2 + b2, axis=-1)
    assert probs.shape == (batch, action_size)
    assert jnp.allclose(probs, ref, atol=1e-4, rtol=1e-4)
    assert jnp.allclose(jnp.sum(probs, axis=-1), 1.0, atol=1e-5)

    print("KERNEL_OK")
</pallas_src>

<mosaic_0001>
module attributes {stable_mosaic.version = 11 : i64} {
  func.func @actor_kernel(%arg0: i32, %arg1: memref<4x256xf32, #tpu.memory_space<vmem>>, %arg2: memref<64x4xf32, #tpu.memory_space<vmem>>, %arg3: memref<64x1xf32, #tpu.memory_space<vmem>>, %arg4: memref<2x64xf32, #tpu.memory_space<vmem>>, %arg5: memref<2x1xf32, #tpu.memory_space<vmem>>, %arg6: memref<2x256xf32, #tpu.memory_space<vmem>>) attributes {dimension_semantics = [#tpu.dimension_semantics<parallel>], iteration_bounds = array<i64: 1>, scalar_prefetch = 0 : i64, scratch_operands = 0 : i64, tpu.core_type = #tpu.core_type<tc>, window_params = [{transform_indices = @transform_0, window_bounds = array<i64: 4, 256>}, {pipeline_mode = #tpu.pipeline_mode<synchronous>, transform_indices = @transform_1, window_bounds = array<i64: 64, 4>}, {pipeline_mode = #tpu.pipeline_mode<synchronous>, transform_indices = @transform_2, window_bounds = array<i64: 64, 1>}, {pipeline_mode = #tpu.pipeline_mode<synchronous>, transform_indices = @transform_3, window_bounds = array<i64: 2, 64>}, {pipeline_mode = #tpu.pipeline_mode<synchronous>, transform_indices = @transform_4, window_bounds = array<i64: 2, 1>}, {transform_indices = @transform_5, window_bounds = array<i64: 2, 256>}]} {
    %c0 = arith.constant 0 : index
    %c0_0 = arith.constant 0 : index
    %0 = vector.load %arg2[%c0, %c0_0] : memref<64x4xf32, #tpu.memory_space<vmem>>, vector<64x4xf32>
    %c0_1 = arith.constant 0 : index
    %c0_2 = arith.constant 0 : index
    %1 = vector.load %arg1[%c0_1, %c0_2] : memref<4x256xf32, #tpu.memory_space<vmem>>, vector<4x256xf32>
    %cst = arith.constant dense<0.000000e+00> : vector<64x256xf32>
    %2 = tpu.matmul %0, %1, %cst {dimension_numbers = #tpu.dot_dimension_numbers<[1], [0], [0], [1], [0, 0, 1, 1], [], []>} : vector<64x4xf32>, vector<4x256xf32>, vector<64x256xf32> -> vector<64x256xf32>
    %c0_3 = arith.constant 0 : index
    %c0_4 = arith.constant 0 : index
    %3 = vector.load %arg3[%c0_3, %c0_4] : memref<64x1xf32, #tpu.memory_space<vmem>>, vector<64x1xf32>
    %4 = vector.broadcast %3 : vector<64x1xf32> to vector<64x256xf32>
    %5 = arith.addf %2, %4 : vector<64x256xf32>
    %6 = math.tanh %5 : vector<64x256xf32>
    %c0_5 = arith.constant 0 : index
    %c0_6 = arith.constant 0 : index
    %7 = vector.load %arg4[%c0_5, %c0_6] : memref<2x64xf32, #tpu.memory_space<vmem>>, vector<2x64xf32>
    %cst_7 = arith.constant dense<0.000000e+00> : vector<2x256xf32>
    %8 = tpu.matmul %7, %6, %cst_7 {dimension_numbers = #tpu.dot_dimension_numbers<[1], [0], [0], [1], [0, 0, 1, 1], [], []>} : vector<2x64xf32>, vector<64x256xf32>, vector<2x256xf32> -> vector<2x256xf32>
    %c0_8 = arith.constant 0 : index
    %c0_9 = arith.constant 0 : index
    %9 = vector.load %arg5[%c0_8, %c0_9] : memref<2x1xf32, #tpu.memory_space<vmem>>, vector<2x1xf32>
    %10 = vector.broadcast %9 : vector<2x1xf32> to vector<2x256xf32>
    %11 = arith.addf %8, %10 : vector<2x256xf32>
    %cst_10 = arith.constant dense<0xFF800000> : vector<256xf32>
    %12 = vector.multi_reduction <maximumf>, %11, %cst_10 [0] : vector<2x256xf32> to vector<256xf32>
    %13 = vector.shape_cast %12 : vector<256xf32> to vector<1x256xf32>
    %14 = vector.broadcast %13 : vector<1x256xf32> to vector<2x256xf32>
    %15 = arith.subf %11, %14 : vector<2x256xf32>
    %16 = math.exp %15 : vector<2x256xf32>
    %cst_11 = arith.constant dense<0.000000e+00> : vector<256xf32>
    %17 = vector.multi_reduction <add>, %16, %cst_11 [0] : vector<2x256xf32> to vector<256xf32>
    %18 = vector.shape_cast %17 : vector<256xf32> to vector<1x256xf32>
    %19 = vector.broadcast %18 : vector<1x256xf32> to vector<2x256xf32>
    %20 = arith.divf %16, %19 : vector<2x256xf32>
    %c0_12 = arith.constant 0 : index
    %c0_13 = arith.constant 0 : index
    %21 = vector.load %arg6[%c0_12, %c0_13] : memref<2x256xf32, #tpu.memory_space<vmem>>, vector<2x256xf32>
    tpu.vector_store %arg6[%c0_12, %c0_13], %20 {strides = array<i32>} : memref<2x256xf32, #tpu.memory_space<vmem>>, vector<2x256xf32>,
    return
  }
  func.func @transform_0(%arg0: i32) -> (i32, i32) {
    %c0_i32 = arith.constant 0 : i32
    %c0_i32_0 = arith.constant 0 : i32
    return %c0_i32, %arg0 : i32, i32
  }
  func.func @transform_1(%arg0: i32) -> (i32, i32) {
    %c0_i32 = arith.constant 0 : i32
    %c0_i32_0 = arith.constant 0 : i32
    %c0_i32_1 = arith.constant 0 : i32
    return %c0_i32, %c0_i32_0 : i32, i32
  }
  func.func @transform_2(%arg0: i32) -> (i32, i32) {
    %c0_i32 = arith.constant 0 : i32
    %c0_i32_0 = arith.constant 0 : i32
    %c0_i32_1 = arith.constant 0 : i32
    return %c0_i32, %c0_i32_0 : i32, i32
  }
  func.func @transform_3(%arg0: i32) -> (i32, i32) {
    %c0_i32 = arith.constant 0 : i32
    %c0_i32_0 = arith.constant 0 : i32
    %c0_i32_1 = arith.constant 0 : i32
    return %c0_i32, %c0_i32_0 : i32, i32
  }
  func.func @transform_4(%arg0: i32) -> (i32, i32) {
    %c0_i32 = arith.constant 0 : i32
    %c0_i32_0 = arith.constant 0 : i32
    %c0_i32_1 = arith.constant 0 : i32
    return %c0_i32, %c0_i32_0 : i32, i32
  }
  func.func @transform_5(%arg0: i32) -> (i32, i32) {
    %c0_i32 = arith.constant 0 : i32
    %c0_i32_0 = arith.constant 0 : i32
    return %c0_i32, %arg0 : i32, i32
  }
}

</mosaic_0001>

<bundles_post_ra>
// kernel: actor_forward.1
= control target key start
LH: loop header
LB: loop body
LE: loop exit
PB: predicated region body
PF: predicated region fallthrough
CT: control target
= control target key end

     0   :  { %vm104_vm0 = vcmask 1043456   ;;  %v432_v1 = vmov 0.0   ;;  %v433_v2 = vmov 0   ;;  %vm79_vm1 = vcmask 31744   ;;  %s536_s0 = inlined_call_operand.vmem [shape: f32[4,256], index: 0, kind: input, shape index: {}]   ;;  %s537_s1 = inlined_call_operand.vmem [shape: f32[64,4], index: 1, kind: input, shape index: {}]   ;;  %s538_s2 = inlined_call_operand.vmem [shape: f32[64,1], index: 2, kind: input, shape index: {}]   ;;  %s539_s4 = inlined_call_operand.vmem [shape: f32[2,1], index: 4, kind: input, shape index: {}]   ;;  %s540_s3 = inlined_call_operand.vmem [shape: f32[2,64], index: 3, kind: input, shape index: {}]   ;;  %s541_s5 = inlined_call_operand.vmem [shape: f32[2,256], index: 5, kind: output, shape index: {}]  }
   0x1   :  { %v28_v0 = vld [vmem:[%s536_s0] sm:$0xff]  ;;  %173 = vmatprep.mubr.f32.mxu0 %v432_v1  ;;  %390 = vset.pattern.permute.xlu1 %v433_v2  ;;  %v34_v5 = vld [vmem:[%s538_s2 + $0x28] sm:$0xff]  ;;  %v36_v6 = vld [vmem:[%s538_s2 + $0x38] sm:$0xff]  ;;  %vm245_vm2 = vcmask 523264   ;;  %vm320_vm3 = vcmask 1041408  }
   0x2   :  { %v78_v3 = vcombine.high %v28_v0, %v28_v0  ;;  %389 = vset.pattern.permute.xlu0 %v433_v2  ;;  %313 = vmatprep.mubr.f32.mxu1 %v432_v1  ;;  %v20_v4 = vld [vmem:[%s537_s1] sm:$0xff]  ;;  %v21_v8 = vld [vmem:[%s537_s1 + $0x8] sm:$0xff]  ;;  %v35_v9 = vld [vmem:[%s538_s2 + $0x30] sm:$0xff] }
   0x3   :  { %64 = vperm.xlu1 %390, %v34_v5   ;;  %74 = vperm.xlu0 %389, %v36_v6   ;;  %v33_v7 = vld [vmem:[%s538_s2 + $0x20] sm:$0xff]  ;;  %v31_v10 = vld [vmem:[%s538_s2 + $0x10] sm:$0xff]  ;;  %v32_v12 = vld [vmem:[%s538_s2 + $0x18] sm:$0xff] }
   0x4   :  { %375 = vmatprep.subr.msk.mxu0 %vm104_vm0, %v78_v3  ;;  %v22_v11 = vld [vmem:[%s537_s1 + $0x10] sm:$0xff]  ;;  %v29_v13 = vld [vmem:[%s538_s2] sm:$0xff]  ;;  %v23_v14 = vld [vmem:[%s537_s1 + $0x18] sm:$0xff] }
   0x5   :  { %376 = vmatpush1.msk.msra.mxu0 %vm104_vm0, %v28_v0  ;;  %v30_v15 = vld [vmem:[%s538_s2 + $0x8] sm:$0xff]  ;;  %v24_v16 = vld [vmem:[%s537_s1 + $0x20] sm:$0xff]  ;;  %v26_v19 = vld [vmem:[%s537_s1 + $0x30] sm:$0xff] }
   0x6   :  { %377 = vmatmul.mubr.msk.f32.vlgmr.msra.gmra.mxu0 %vm79_vm1, %v20_v4  ;;  %v239_v17 = vld [vmem:[%s539_s4] sm:$0x3]  ;;  %v25_v18 = vld [vmem:[%s537_s1 + $0x28] sm:$0xff]  ;;  %v27_v20 = vld [vmem:[%s537_s1 + $0x38] sm:$0xff] }
   0x7   :  { %179 = vmatprep.mubr.f32.mxu0 %v432_v1  ;;  %59 = vperm.xlu1 %390, %v33_v7  }
   0x8   :  { %69 = vperm.xlu0 %389, %v35_v9  }
   0xa   :  { %378 = vmatmul.mubr.msk.f32.gmra.mxu0 %vm79_vm1, %v21_v8 }
   0xb   :  { %185 = vmatprep.mubr.f32.mxu0 %v432_v1  ;;  %49 = vperm.xlu1 %390, %v31_v10  }
   0xc   :  { %54 = vperm.xlu0 %389, %v32_v12   ;;  %v238_v12 = vld [vmem:[%s540_s3] sm:$0x3] }
   0xe   :  { %379 = vmatmul.mubr.msk.f32.gmra.mxu0 %vm79_vm1, %v22_v11 }
   0xf   :  { %191 = vmatprep.mubr.f32.mxu0 %v432_v1  ;;  %39 = vperm.xlu1 %390, %v29_v13  }
  0x10   :  { %44 = vperm.xlu0 %389, %v30_v15  }
  0x12   :  { %380 = vmatmul.mubr.msk.f32.gmra.mxu0 %vm79_vm1, %v23_v14 }
  0x13   :  { %197 = vmatprep.mubr.f32.mxu0 %v432_v1 }
  0x14   :  { %242 = vperm.xlu0 %389, %v239_v17  }
  0x16   :  { %381 = vmatmul.mubr.msk.f32.gmra.mxu0 %vm79_vm1, %v24_v16 }
  0x17   :  { %203 = vmatprep.mubr.f32.mxu0 %v432_v1 }
  0x1a   :  { %382 = vmatmul.mubr.msk.f32.gmra.mxu0 %vm79_vm1, %v25_v18 }
  0x1b   :  { %209 = vmatprep.mubr.f32.mxu0 %v432_v1 }
  0x1e   :  { %383 = vmatmul.mubr.msk.f32.gmra.mxu0 %vm79_vm1, %v26_v19 }
  0x1f   :  { %215 = vmatprep.mubr.f32.mxu0 %v432_v1 }
  0x22   :  { %384 = vmatmul.mubr.msk.f32.gmra.mxu0 %vm79_vm1, %v27_v20 }
  0x7e   :  { %v75_v32 = vpop.permute.xlu0 %74  ;;  %v65_v34 = vpop.permute.xlu1 %64 }
  0x82   :  { %v60_v39 = vpop.permute.xlu1 %59 }
  0x83   :  { %v70_v37 = vpop.permute.xlu0 %69 }
  0x86   :  { %v50_v48 = vpop.permute.xlu1 %49 }
  0x87   :  { %v55_v45 = vpop.permute.xlu0 %54 }
  0x8a   :  { %v40_v56 = vpop.permute.xlu1 %39 }
  0x8b   :  { %v45_v53 = vpop.permute.xlu0 %44 }
  0x8f   :  { %v243_v14 = vpop.permute.xlu0 %242 }
  0xc6   :  { %v175_v21 = vpop.f32.mrf.mxu0 }
  0xc7   :  { %v176_v60 = vadd.f32 %v175_v21, %v40_v56 }
  0xc8   :  { %v177_v22 = vpop.f32.mrf.mxu0 }
  0xc9   :  { %v178_v59 = vadd.f32 %v177_v22, %v40_v56 }
  0xca   :  { %v181_v23 = vpop.f32.mrf.mxu0 }
  0xcb   :  { %v182_v58 = vadd.f32 %v181_v23, %v45_v53 }
  0xcc   :  { %v183_v24 = vpop.f32.mrf.mxu0 }
  0xcd   :  { %v184_v57 = vadd.f32 %v183_v24, %v45_v53 }
  0xce   :  { %v187_v25 = vpop.f32.mrf.mxu0 }
  0xcf   :  { %v188_v55 = vadd.f32 %v187_v25, %v50_v48 }
  0xd0   :  { %v189_v26 = vpop.f32.mrf.mxu0 }
  0xd1   :  { %v190_v54 = vadd.f32 %v189_v26, %v50_v48 }
  0xd2   :  { %v193_v27 = vpop.f32.mrf.mxu0 }
  0xd3   :  { %v194_v52 = vadd.f32 %v193_v27, %v55_v45 }
  0xd4   :  { %v195_v28 = vpop.f32.mrf.mxu0 }
  0xd5   :  { %v196_v51 = vadd.f32 %v195_v28, %v55_v45 }
  0xd6   :  { %v199_v29 = vpop.f32.mrf.mxu0 }
  0xd7   :  { %v200_v50 = vadd.f32 %v199_v29, %v60_v39 }
  0xd8   :  { %v201_v30 = vpop.f32.mrf.mxu0 }
  0xd9   :  { %v202_v49 = vadd.f32 %v201_v30, %v60_v39 }
  0xda   :  { %v205_v31 = vpop.f32.mrf.mxu0 }
  0xdb   :  { %v206_v47 = vadd.f32 %v205_v31, %v65_v34 }
  0xdc   :  { %v207_v33 = vpop.f32.mrf.mxu0 }
  0xdd   :  { %v208_v46 = vadd.f32 %v207_v33, %v65_v34 }
  0xde   :  { %v211_v35 = vpop.f32.mrf.mxu0 }
  0xdf   :  { %v212_v44 = vadd.f32 %v211_v35, %v70_v37 }
  0xe0   :  { %v213_v36 = vpop.f32.mrf.mxu0 }
  0xe1   :  { %v214_v42 = vadd.f32 %v213_v36, %v70_v37 }
  0xe2   :  { %v217_v38 = vpop.f32.mrf.mxu0 }
  0xe3   :  { %v218_v40 = vadd.f32 %v217_v38, %v75_v32 }
  0xe4   :  { %v219_v41 = vpop.f32.mrf.mxu0 }
  0xe5   :  { %v220_v43 = vadd.f32 %v219_v41, %v75_v32 }
  0xe7   :  { %392 = vtanh.f32 %v220_v43 }
  0xe8   :  { %394 = vtanh.f32 %v218_v40 }
  0xe9   :  { %396 = vtanh.f32 %v214_v42 }
  0xea   :  { %398 = vtanh.f32 %v212_v44 }
  0xeb   :  { %400 = vtanh.f32 %v208_v46 }
  0xec   :  { %402 = vtanh.f32 %v206_v47 }
  0xed   :  { %404 = vtanh.f32 %v202_v49 }
  0xee   :  { %406 = vtanh.f32 %v200_v50 }
  0xef   :  { %408 = vtanh.f32 %v196_v51 }
  0xf0   :  { %410 = vtanh.f32 %v194_v52 }
  0xf1   :  { %412 = vtanh.f32 %v190_v54 }
  0xf2   :  { %414 = vtanh.f32 %v188_v55 }
  0xf3   :  { %416 = vtanh.f32 %v184_v57 }
  0xf4   :  { %v393_v61 = vpop.eup %392  ;;  %418 = vtanh.f32 %v182_v58 }
  0xf5   :  { %v395_v62 = vpop.eup %394  ;;  %420 = vtanh.f32 %v178_v59  ;;  %265 = vmatprep.subr.mxu1 %v393_v61 }
  0xf6   :  { %v397_v63 = vpop.eup %396  ;;  %422 = vtanh.f32 %v176_v60  ;;  %266 = vmatpush1.msra.mxu1 %v395_v62 }
  0xf7   :  { %v399_v0 = vpop.eup %398  ;;  %267 = vmatprep.subr.mxu1 %v397_v63 }
  0xf8   :  { %v401_v1 = vpop.eup %400  ;;  %268 = vmatpush1.msra.mxu1 %v399_v0 }
  0xf9   :  { %v403_v2 = vpop.eup %402  ;;  %269 = vmatprep.subr.mxu1 %v401_v1 }
  0xfa   :  { %v405_v3 = vpop.eup %404  ;;  %270 = vmatpush1.msra.mxu1 %v403_v2 }
  0xfb   :  { %v407_v4 = vpop.eup %406  ;;  %271 = vmatprep.subr.mxu1 %v405_v3 }
  0xfc   :  { %v409_v5 = vpop.eup %408  ;;  %272 = vmatpush1.msra.mxu1 %v407_v4 }
  0xfd   :  { %v411_v6 = vpop.eup %410  ;;  %273 = vmatprep.subr.mxu1 %v409_v5 }
  0xfe   :  { %v413_v7 = vpop.eup %412  ;;  %274 = vmatpush1.msra.mxu1 %v411_v6 }
  0xff   :  { %v415_v8 = vpop.eup %414  ;;  %275 = vmatprep.subr.mxu1 %v413_v7 }
 0x100   :  { %v417_v9 = vpop.eup %416  ;;  %276 = vmatpush1.msra.mxu1 %v415_v8 }
 0x101   :  { %v419_v10 = vpop.eup %418  ;;  %277 = vmatprep.subr.mxu1 %v417_v9 }
 0x102   :  { %v421_v11 = vpop.eup %420  ;;  %278 = vmatpush1.msra.mxu1 %v419_v10 }
 0x103   :  { %v423_v13 = vpop.eup %422  ;;  %279 = vmatprep.subr.mxu1 %v421_v11 }
 0x104   :  { %280 = vmatpush1.msra.mxu1 %v423_v13 }
 0x105   :  { %385 = vmatmul.mubr.msk.f32.vlgmr.msra.gmra.mxu1 %vm245_vm2, %v238_v12 }
 0x1c5   :  { %v315_v15 = vpop.f32.mrf.mxu1 }
 0x1c6   :  { %v316_v16 = vadd.f32 %v315_v15, %v243_v14 }
 0x1c7   :  { %v317_v17 = vpop.f32.mrf.mxu1 }
 0x1c8   :  { %v321_v18 = vsel %vm320_vm3, %v316_v16, -inf  ;;  %v318_v19 = vadd.f32 %v317_v17, %v243_v14 }
 0x1c9   :  { %v322_v20 = vrot.slane %v321_v18, 4 }
 0x1ca   :  { %v328_v21 = vsel %vm320_vm3, %v318_v19, -inf }
 0x1cb   :  { %v323_v22 = vmax.f32 %v321_v18, %v322_v20  ;;  %v329_v23 = vrot.slane %v328_v21, 4 }
 0x1cd   :  { %v324_v24 = vrot.slane %v323_v22, 2  ;;  %v330_v25 = vmax.f32 %v328_v21, %v329_v23 }
 0x1cf   :  { %v325_v26 = vmax.f32 %v323_v22, %v324_v24  ;;  %v331_v27 = vrot.slane %v330_v25, 2 }
 0x1d1   :  { %v326_v28 = vrot.slane %v325_v26, 1  ;;  %v332_v29 = vmax.f32 %v330_v25, %v331_v27 }
 0x1d3   :  { %v327_v30 = vmax.f32 %v325_v26, %v326_v28  ;;  %v333_v31 = vrot.slane %v332_v29, 1 }
 0x1d5   :  { %v335_v32 = vsub.f32 %v316_v16, %v327_v30  ;;  %v334_v33 = vmax.f32 %v332_v29, %v333_v31 }
 0x1d7   :  { %v337_v34 = vmul.f32 1.442695, %v335_v32  ;;  %v336_v35 = vsub.f32 %v318_v19, %v334_v33 }
 0x1d9   :  { %424 = vpow2.f32 %v337_v34  ;;  %v339_v36 = vmul.f32 1.442695, %v336_v35 }
 0x1db   :  { %426 = vpow2.f32 %v339_v36 }
 0x1e6   :  { %v425_v37 = vpop.eup %424 }
 0x1e7   :  { %v341_v38 = vsel %vm320_vm3, %v425_v37, 0.0 }
 0x1e8   :  { %v427_v39 = vpop.eup %426  ;;  %v342_v40 = vrot.slane %v341_v38, 4 }
 0x1e9   :  { %v348_v41 = vsel %vm320_vm3, %v427_v39, 0.0 }
 0x1ea   :  { %v343_v42 = vadd.f32 %v342_v40, %v341_v38  ;;  %v349_v43 = vrot.slane %v348_v41, 4 }
 0x1ec   :  { %v344_v44 = vrot.slane %v343_v42, 2  ;;  %v350_v45 = vadd.f32 %v349_v43, %v348_v41 }
 0x1ee   :  { %v345_v46 = vadd.f32 %v344_v44, %v343_v42  ;;  %v351_v47 = vrot.slane %v350_v45, 2 }
 0x1f0   :  { %v346_v48 = vrot.slane %v345_v46, 1  ;;  %v352_v49 = vadd.f32 %v351_v47, %v350_v45 }
 0x1f2   :  { %v347_v50 = vadd.f32 %v346_v48, %v345_v46  ;;  %v353_v51 = vrot.slane %v352_v49, 1 }
 0x1f4   :  { %428 = vrcp.f32 %v347_v50  ;;  %v354_v52 = vadd.f32 %v353_v51, %v352_v49 }
 0x1f6   :  { %430 = vrcp.f32 %v354_v52 }
 0x201   :  { %v429_v53 = vpop.eup %428 }
 0x202   :  { %v356_v55 = vmul.f32 %v429_v53, %v425_v37 }
 0x203   :  { %v431_v54 = vpop.eup %430 }
 0x204   :  { %v358_v56 = vmul.f32 %v431_v54, %v427_v39 }
 0x206   :  { %v361_v57 = vcombine.low %v356_v55, %v358_v56 }
 0x208   :  { %386 = vst.sshfl [vmem:[%s541_s5] sm:$0x33 pattern:$0x76325410] %v361_v57 }

</bundles_post_ra>
